<compile_context>
chip_gen: v5e
topology: v5e:2x2
jax: 0.10.0
libtpu: 0.0.40
codegen_flags: <defaults>
</compile_context>

<pallas_src>
import functools

import jax
import jax.numpy as jnp
import numpy as np
from jax.experimental import pallas as pl
from jax.experimental.pallas import tpu as pltpu


def _tcn_kernel(x_ref, w_ref, shift_ref, o_ref, xpad_ref,
                *, K, stride, pad, T, T_out, V):
    # x_ref:     (1, C_in, T*V)        input slab for this batch element (lane-dense)
    # w_ref:     (K, C_out, C_in)      conv weights with BN scale pre-folded
    # shift_ref: (C_out, 1)            fused BN shift  ((bias-mean)*scale + beta)
    # o_ref:     (1, C_out, T_out*V)   lane-dense output
    # xpad_ref:  (C_in, (T+2*pad)*V)   VMEM scratch: temporally padded slab
    C_in = x_ref.shape[1]
    C_out = w_ref.shape[1]

    # Build the padded slab in VMEM (halo handled in-kernel; no extra HBM pass).
    # Halos are re-zeroed every step: cheap, and safe under megacore splitting.
    if pad > 0:
        xpad_ref[:, :pad * V] = jnp.zeros((C_in, pad * V), xpad_ref.dtype)
        xpad_ref[:, pad * V + T * V:] = jnp.zeros((C_in, pad * V), xpad_ref.dtype)
    xpad_ref[:, pad * V:pad * V + T * V] = x_ref[0]

    acc = jnp.zeros((C_out, T_out * V), jnp.float32)
    # Static unrolled loop over the K temporal taps; each tap is one MXU matmul
    # whose RHS is a pure lane slice (no reshape/relayout inside the loop).
    for k in range(K):
        if stride == 1:
            xs = xpad_ref[:, k * V:k * V + T_out * V]                 # (C_in, T_out*V)
        else:
            # TODO(synk): stride>1 path is correct but not lane-optimal (strided
            # temporal slice forces a relayout); unit_tcn defaults to stride=1.
            xs = xpad_ref[...].reshape(C_in, T + 2 * pad, V)[
                :, k:k + (T_out - 1) * stride + 1:stride, :].reshape(C_in, T_out * V)
        acc += jnp.dot(w_ref[k], xs, preferred_element_type=jnp.float32)

    o_ref[0] = (acc + shift_ref[...]).astype(o_ref.dtype)


def unit_tcn_forward(x, weight, bias, gamma, beta, run_mean, run_var,
                     *, kernel_size=9, stride=1, eps=1e-5):
    """Fused Conv2d((K,1), pad=(K//2,0), stride=(s,1)) + BatchNorm2d (inference)."""
    N, C_in, T, V = x.shape
    C_out = weight.shape[0]
    K = kernel_size
    pad = (K - 1) // 2
    T_out = (T + 2 * pad - K) // stride + 1
    T_pad = T + 2 * pad

    # Fold conv bias + BN into per-channel scale/shift; fold the scale into the
    # conv weights so the kernel epilogue is a single add.
    scale = gamma / jnp.sqrt(run_var + eps)                      # (C_out,)
    shift = (bias - run_mean) * scale + beta                     # (C_out,)
    w = weight[:, :, :, 0] * scale[:, None, None]                # (C_out, C_in, K)
    w_taps = jnp.transpose(w, (2, 0, 1)).astype(x.dtype)         # (K, C_out, C_in)
    shift2 = shift.reshape(C_out, 1).astype(jnp.float32)

    # Lane-dense views: (N, C_in, T*V) in, (N, C_out, T_out*V) out (free reshapes).
    x_flat = x.reshape(N, C_in, T * V)

    kernel = functools.partial(_tcn_kernel, K=K, stride=stride, pad=pad,
                               T=T, T_out=T_out, V=V)

    # VMEM budget: double-buffered in/out blocks + weights + padded-slab scratch
    # + f32 accumulator, capped for v7x's 64 MiB physical VMEM.
    # TODO(synk): for very long sequences on v7x, additionally tile the grid over
    # T (with a K-1 halo) instead of holding the full-T slab per grid step.
    isz = jnp.dtype(x.dtype).itemsize
    vmem_needed = (2 * (C_in * T * V + C_out * T_out * V + K * C_out * C_in) * isz
                   + C_in * T_pad * V * isz
                   + C_out * T_out * V * 4 + (4 << 20))
    vmem_limit = int(min(max(vmem_needed, 8 << 20), 64 << 20))

    out = pl.pallas_call(
        kernel,
        out_shape=jax.ShapeDtypeStruct((N, C_out, T_out * V), x.dtype),
        grid_spec=pltpu.PrefetchScalarGridSpec(
            num_scalar_prefetch=0,
            grid=(N,),
            in_specs=[
                pl.BlockSpec((1, C_in, T * V), lambda n: (n, 0, 0)),
                pl.BlockSpec((K, C_out, C_in), lambda n: (0, 0, 0)),
                pl.BlockSpec((C_out, 1), lambda n: (0, 0)),
            ],
            out_specs=pl.BlockSpec((1, C_out, T_out * V), lambda n: (n, 0, 0)),
            scratch_shapes=[pltpu.VMEM((C_in, T_pad * V), x.dtype)],
        ),
        compiler_params=pltpu.CompilerParams(
            dimension_semantics=("parallel",),
            vmem_limit_bytes=vmem_limit),
    )(x_flat, w_taps, shift2)

    return out.reshape(N, C_out, T_out, V)


def _reference(x, weight, bias, gamma, beta, run_mean, run_var,
               *, kernel_size=9, stride=1, eps=1e-5):
    pad = (kernel_size - 1) // 2
    y = jax.lax.conv_general_dilated(
        x, weight, window_strides=(stride, 1),
        padding=((pad, pad), (0, 0)),
        dimension_numbers=("NCHW", "OIHW", "NCHW"))
    y = y + bias.reshape(1, -1, 1, 1)
    y = (y - run_mean.reshape(1, -1, 1, 1)) / jnp.sqrt(run_var.reshape(1, -1, 1, 1) + eps)
    return y * gamma.reshape(1, -1, 1, 1) + beta.reshape(1, -1, 1, 1)


if __name__ == "__main__":
    # Small shapes consistent with the module: x is (N, C_in, T, V).
    N, C_in, C_out, T, V = 2, 4, 8, 16, 16
    K, stride = 9, 1

    key = jax.random.PRNGKey(0)
    kx, kw = jax.random.split(key)

    x = jax.random.normal(kx, (N, C_in, T, V), dtype=jnp.float32)

    # conv_init: kaiming_normal_(mode='fan_out') on weight (C_out, C_in, K, 1)
    # fan_out = C_out * K * 1, std = sqrt(2 / fan_out); bias = 0.
    fan_out = C_out * K * 1
    std = float(np.sqrt(2.0 / fan_out))
    weight = jax.random.normal(kw, (C_out, C_in, K, 1), dtype=jnp.float32) * std
    bias = jnp.zeros((C_out,), jnp.float32)

    # bn_init(bn, 1): gamma = 1, beta = 0; fresh running stats: mean = 0, var = 1.
    gamma = jnp.ones((C_out,), jnp.float32)
    beta = jnp.zeros((C_out,), jnp.float32)
    run_mean = jnp.zeros((C_out,), jnp.float32)
    run_var = jnp.ones((C_out,), jnp.float32)

    out = unit_tcn_forward(x, weight, bias, gamma, beta, run_mean, run_var,
                           kernel_size=K, stride=stride)
    out = jax.block_until_ready(out)

    ref = _reference(x, weight, bias, gamma, beta, run_mean, run_var,
                     kernel_size=K, stride=stride)
    np.testing.assert_allclose(np.asarray(out), np.asarray(ref), rtol=1e-4, atol=1e-4)

    print("KERNEL_OK")
</pallas_src>

<mosaic_0001>
module attributes {stable_mosaic.version = 11 : i64} {
  func.func @_tcn_kernel(%arg0: i32, %arg1: memref<1x4x256xf32, #tpu.memory_space<vmem>>, %arg2: memref<9x8x4xf32, #tpu.memory_space<vmem>>, %arg3: memref<8x1xf32, #tpu.memory_space<vmem>>, %arg4: memref<1x8x256xf32, #tpu.memory_space<vmem>>, %arg5: memref<4x384xf32, #tpu.memory_space<vmem>>) attributes {dimension_semantics = [#tpu.dimension_semantics<parallel>], iteration_bounds = array<i64: 2>, scalar_prefetch = 0 : i64, scratch_operands = 1 : i64, tpu.core_type = #tpu.core_type<tc>, window_params = [{transform_indices = @transform_0, window_bounds = array<i64: 1, 4, 256>}, {pipeline_mode = #tpu.pipeline_mode<synchronous>, transform_indices = @transform_1, window_bounds = array<i64: 9, 8, 4>}, {pipeline_mode = #tpu.pipeline_mode<synchronous>, transform_indices = @transform_2, window_bounds = array<i64: 8, 1>}, {transform_indices = @transform_3, window_bounds = array<i64: 1, 8, 256>}]} {
    %cst = arith.constant 0.000000e+00 : f32
    %0 = vector.broadcast %cst : f32 to vector<4x64xf32>
    %c0 = arith.constant 0 : index
    %c0_0 = arith.constant 0 : index
    %1 = vector.load %arg5[%c0, %c0_0] : memref<4x384xf32, #tpu.memory_space<vmem>>, vector<4x64xf32>
    tpu.vector_store %arg5[%c0, %c0_0], %0 {strides = array<i32>} : memref<4x384xf32, #tpu.memory_space<vmem>>, vector<4x64xf32>,
    %cst_1 = arith.constant 0.000000e+00 : f32
    %2 = vector.broadcast %cst_1 : f32 to vector<4x64xf32>
    %c0_2 = arith.constant 0 : index
    %c320 = arith.constant 320 : index
    %3 = vector.load %arg5[%c0_2, %c320] : memref<4x384xf32, #tpu.memory_space<vmem>>, vector<4x64xf32>
    tpu.vector_store %arg5[%c0_2, %c320], %2 {strides = array<i32>} : memref<4x384xf32, #tpu.memory_space<vmem>>, vector<4x64xf32>,
    %c0_3 = arith.constant 0 : index
    %c0_4 = arith.constant 0 : index
    %c0_5 = arith.constant 0 : index
    %4 = vector.load %arg1[%c0_3, %c0_4, %c0_5] : memref<1x4x256xf32, #tpu.memory_space<vmem>>, vector<1x4x256xf32>
    %5 = vector.shape_cast %4 : vector<1x4x256xf32> to vector<4x256xf32>
    %c0_6 = arith.constant 0 : index
    %c64 = arith.constant 64 : index
    %6 = vector.load %arg5[%c0_6, %c64] : memref<4x384xf32, #tpu.memory_space<vmem>>, vector<4x256xf32>
    tpu.vector_store %arg5[%c0_6, %c64], %5 {strides = array<i32>} : memref<4x384xf32, #tpu.memory_space<vmem>>, vector<4x256xf32>,
    %cst_7 = arith.constant 0.000000e+00 : f32
    %7 = vector.broadcast %cst_7 : f32 to vector<8x256xf32>
    %c0_8 = arith.constant 0 : index
    %c0_9 = arith.constant 0 : index
    %8 = vector.load %arg5[%c0_8, %c0_9] : memref<4x384xf32, #tpu.memory_space<vmem>>, vector<4x256xf32>
    %c0_10 = arith.constant 0 : index
    %c0_11 = arith.constant 0 : index
    %c0_12 = arith.constant 0 : index
    %9 = vector.load %arg2[%c0_10, %c0_11, %c0_12] : memref<9x8x4xf32, #tpu.memory_space<vmem>>, vector<1x8x4xf32>
    %10 = vector.shape_cast %9 : vector<1x8x4xf32> to vector<8x4xf32>
    %cst_13 = arith.constant dense<0.000000e+00> : vector<8x256xf32>
    %11 = tpu.matmul %10, %8, %cst_13 {dimension_numbers = #tpu.dot_dimension_numbers<[1], [0], [0], [1], [0, 0, 1, 1], [], []>} : vector<8x4xf32>, vector<4x256xf32>, vector<8x256xf32> -> vector<8x256xf32>
    %12 = arith.addf %7, %11 : vector<8x256xf32>
    %c0_14 = arith.constant 0 : index
    %c16 = arith.constant 16 : index
    %13 = vector.load %arg5[%c0_14, %c16] : memref<4x384xf32, #tpu.memory_space<vmem>>, vector<4x256xf32>
    %c1 = arith.constant 1 : index
    %c0_15 = arith.constant 0 : index
    %c0_16 = arith.constant 0 : index
    %14 = vector.load %arg2[%c1, %c0_15, %c0_16] : memref<9x8x4xf32, #tpu.memory_space<vmem>>, vector<1x8x4xf32>
    %15 = vector.shape_cast %14 : vector<1x8x4xf32> to vector<8x4xf32>
    %cst_17 = arith.constant dense<0.000000e+00> : vector<8x256xf32>
    %16 = tpu.matmul %15, %13, %cst_17 {dimension_numbers = #tpu.dot_dimension_numbers<[1], [0], [0], [1], [0, 0, 1, 1], [], []>} : vector<8x4xf32>, vector<4x256xf32>, vector<8x256xf32> -> vector<8x256xf32>
    %17 = arith.addf %12, %16 : vector<8x256xf32>
    %c0_18 = arith.constant 0 : index
    %c32 = arith.constant 32 : index
    %18 = vector.load %arg5[%c0_18, %c32] : memref<4x384xf32, #tpu.memory_space<vmem>>, vector<4x256xf32>
    %c2 = arith.constant 2 : index
    %c0_19 = arith.constant 0 : index
    %c0_20 = arith.constant 0 : index
    %19 = vector.load %arg2[%c2, %c0_19, %c0_20] : memref<9x8x4xf32, #tpu.memory_space<vmem>>, vector<1x8x4xf32>
    %20 = vector.shape_cast %19 : vector<1x8x4xf32> to vector<8x4xf32>
    %cst_21 = arith.constant dense<0.000000e+00> : vector<8x256xf32>
    %21 = tpu.matmul %20, %18, %cst_21 {dimension_numbers = #tpu.dot_dimension_numbers<[1], [0], [0], [1], [0, 0, 1, 1], [], []>} : vector<8x4xf32>, vector<4x256xf32>, vector<8x256xf32> -> vector<8x256xf32>
    %22 = arith.addf %17, %21 : vector<8x256xf32>
    %c0_22 = arith.constant 0 : index
    %c48 = arith.constant 48 : index
    %23 = vector.load %arg5[%c0_22, %c48] : memref<4x384xf32, #tpu.memory_space<vmem>>, vector<4x256xf32>
    %c3 = arith.constant 3 : index
    %c0_23 = arith.constant 0 : index
    %c0_24 = arith.constant 0 : index
    %24 = vector.load %arg2[%c3, %c0_23, %c0_24] : memref<9x8x4xf32, #tpu.memory_space<vmem>>, vector<1x8x4xf32>
    %25 = vector.shape_cast %24 : vector<1x8x4xf32> to vector<8x4xf32>
    %cst_25 = arith.constant dense<0.000000e+00> : vector<8x256xf32>
    %26 = tpu.matmul %25, %23, %cst_25 {dimension_numbers = #tpu.dot_dimension_numbers<[1], [0], [0], [1], [0, 0, 1, 1], [], []>} : vector<8x4xf32>, vector<4x256xf32>, vector<8x256xf32> -> vector<8x256xf32>
    %27 = arith.addf %22, %26 : vector<8x256xf32>
    %c0_26 = arith.constant 0 : index
    %c64_27 = arith.constant 64 : index
    %28 = vector.load %arg5[%c0_26, %c64_27] : memref<4x384xf32, #tpu.memory_space<vmem>>, vector<4x256xf32>
    %c4 = arith.constant 4 : index
    %c0_28 = arith.constant 0 : index
    %c0_29 = arith.constant 0 : index
    %29 = vector.load %arg2[%c4, %c0_28, %c0_29] : memref<9x8x4xf32, #tpu.memory_space<vmem>>, vector<1x8x4xf32>
    %30 = vector.shape_cast %29 : vector<1x8x4xf32> to vector<8x4xf32>
    %cst_30 = arith.constant dense<0.000000e+00> : vector<8x256xf32>
    %31 = tpu.matmul %30, %28, %cst_30 {dimension_numbers = #tpu.dot_dimension_numbers<[1], [0], [0], [1], [0, 0, 1, 1], [], []>} : vector<8x4xf32>, vector<4x256xf32>, vector<8x256xf32> -> vector<8x256xf32>
    %32 = arith.addf %27, %31 : vector<8x256xf32>
    %c0_31 = arith.constant 0 : index
    %c80 = arith.constant 80 : index
    %33 = vector.load %arg5[%c0_31, %c80] : memref<4x384xf32, #tpu.memory_space<vmem>>, vector<4x256xf32>
    %c5 = arith.constant 5 : index
    %c0_32 = arith.constant 0 : index
    %c0_33 = arith.constant 0 : index
    %34 = vector.load %arg2[%c5, %c0_32, %c0_33] : memref<9x8x4xf32, #tpu.memory_space<vmem>>, vector<1x8x4xf32>
    %35 = vector.shape_cast %34 : vector<1x8x4xf32> to vector<8x4xf32>
    %cst_34 = arith.constant dense<0.000000e+00> : vector<8x256xf32>
    %36 = tpu.matmul %35, %33, %cst_34 {dimension_numbers = #tpu.dot_dimension_numbers<[1], [0], [0], [1], [0, 0, 1, 1], [], []>} : vector<8x4xf32>, vector<4x256xf32>, vector<8x256xf32> -> vector<8x256xf32>
    %37 = arith.addf %32, %36 : vector<8x256xf32>
    %c0_35 = arith.constant 0 : index
    %c96 = arith.constant 96 : index
    %38 = vector.load %arg5[%c0_35, %c96] : memref<4x384xf32, #tpu.memory_space<vmem>>, vector<4x256xf32>
    %c6 = arith.constant 6 : index
    %c0_36 = arith.constant 0 : index
    %c0_37 = arith.constant 0 : index
    %39 = vector.load %arg2[%c6, %c0_36, %c0_37] : memref<9x8x4xf32, #tpu.memory_space<vmem>>, vector<1x8x4xf32>
    %40 = vector.shape_cast %39 : vector<1x8x4xf32> to vector<8x4xf32>
    %cst_38 = arith.constant dense<0.000000e+00> : vector<8x256xf32>
    %41 = tpu.matmul %40, %38, %cst_38 {dimension_numbers = #tpu.dot_dimension_numbers<[1], [0], [0], [1], [0, 0, 1, 1], [], []>} : vector<8x4xf32>, vector<4x256xf32>, vector<8x256xf32> -> vector<8x256xf32>
    %42 = arith.addf %37, %41 : vector<8x256xf32>
    %c0_39 = arith.constant 0 : index
    %c112 = arith.constant 112 : index
    %43 = vector.load %arg5[%c0_39, %c112] : memref<4x384xf32, #tpu.memory_space<vmem>>, vector<4x256xf32>
    %c7 = arith.constant 7 : index
    %c0_40 = arith.constant 0 : index
    %c0_41 = arith.constant 0 : index
    %44 = vector.load %arg2[%c7, %c0_40, %c0_41] : memref<9x8x4xf32, #tpu.memory_space<vmem>>, vector<1x8x4xf32>
    %45 = vector.shape_cast %44 : vector<1x8x4xf32> to vector<8x4xf32>
    %cst_42 = arith.constant dense<0.000000e+00> : vector<8x256xf32>
    %46 = tpu.matmul %45, %43, %cst_42 {dimension_numbers = #tpu.dot_dimension_numbers<[1], [0], [0], [1], [0, 0, 1, 1], [], []>} : vector<8x4xf32>, vector<4x256xf32>, vector<8x256xf32> -> vector<8x256xf32>
    %47 = arith.addf %42, %46 : vector<8x256xf32>
    %c0_43 = arith.constant 0 : index
    %c128 = arith.constant 128 : index
    %48 = vector.load %arg5[%c0_43, %c128] : memref<4x384xf32, #tpu.memory_space<vmem>>, vector<4x256xf32>
    %c8 = arith.constant 8 : index
    %c0_44 = arith.constant 0 : index
    %c0_45 = arith.constant 0 : index
    %49 = vector.load %arg2[%c8, %c0_44, %c0_45] : memref<9x8x4xf32, #tpu.memory_space<vmem>>, vector<1x8x4xf32>
    %50 = vector.shape_cast %49 : vector<1x8x4xf32> to vector<8x4xf32>
    %cst_46 = arith.constant dense<0.000000e+00> : vector<8x256xf32>
    %51 = tpu.matmul %50, %48, %cst_46 {dimension_numbers = #tpu.dot_dimension_numbers<[1], [0], [0], [1], [0, 0, 1, 1], [], []>} : vector<8x4xf32>, vector<4x256xf32>, vector<8x256xf32> -> vector<8x256xf32>
    %52 = arith.addf %47, %51 : vector<8x256xf32>
    %c0_47 = arith.constant 0 : index
    %c0_48 = arith.constant 0 : index
    %53 = vector.load %arg3[%c0_47, %c0_48] : memref<8x1xf32, #tpu.memory_space<vmem>>, vector<8x1xf32>
    %54 = vector.broadcast %53 : vector<8x1xf32> to vector<8x256xf32>
    %55 = arith.addf %52, %54 : vector<8x256xf32>
    %c0_49 = arith.constant 0 : index
    %c0_50 = arith.constant 0 : index
    %c0_51 = arith.constant 0 : index
    %56 = vector.load %arg4[%c0_49, %c0_50, %c0_51] : memref<1x8x256xf32, #tpu.memory_space<vmem>>, vector<1x8x256xf32>
    %57 = vector.shape_cast %56 : vector<1x8x256xf32> to vector<8x256xf32>
    %58 = vector.shape_cast %55 : vector<8x256xf32> to vector<1x8x256xf32>
    tpu.vector_store %arg4[%c0_49, %c0_50, %c0_51], %58 {strides = array<i32>} : memref<1x8x256xf32, #tpu.memory_space<vmem>>, vector<1x8x256xf32>,
    return
  }
  func.func @transform_0(%arg0: i32) -> (i32, i32, i32) {
    %c0_i32 = arith.constant 0 : i32
    %c0_i32_0 = arith.constant 0 : i32
    %c0_i32_1 = arith.constant 0 : i32
    return %arg0, %c0_i32, %c0_i32_0 : i32, i32, i32
  }
  func.func @transform_1(%arg0: i32) -> (i32, i32, i32) {
    %c0_i32 = arith.constant 0 : i32
    %c0_i32_0 = arith.constant 0 : i32
    %c0_i32_1 = arith.constant 0 : i32
    %c0_i32_2 = arith.constant 0 : i32
    return %c0_i32, %c0_i32_0, %c0_i32_1 : i32, i32, i32
  }
  func.func @transform_2(%arg0: i32) -> (i32, i32) {
    %c0_i32 = arith.constant 0 : i32
    %c0_i32_0 = arith.constant 0 : i32
    %c0_i32_1 = arith.constant 0 : i32
    return %c0_i32, %c0_i32_0 : i32, i32
  }
  func.func @transform_3(%arg0: i32) -> (i32, i32, i32) {
    %c0_i32 = arith.constant 0 : i32
    %c0_i32_0 = arith.constant 0 : i32
    %c0_i32_1 = arith.constant 0 : i32
    return %arg0, %c0_i32, %c0_i32_0 : i32, i32, i32
  }
}

</mosaic_0001>

<bundles_post_ra>
// kernel: tpu_custom_call.1
= control target key start
LH: loop header
LB: loop body
LE: loop exit
PB: predicated region body
PF: predicated region fallthrough
CT: control target
= control target key end

     0   :  { %8 = vsyncpa [#allocation4], 0  ;;  %s1245_s0 = inlined_call_operand.vmem [shape: f32[2,4,256], index: 0, kind: input, shape index: {}]   ;;  %s1246_s1 = inlined_call_operand.vmem [shape: f32[9,8,4], index: 1, kind: input, shape index: {}]   ;;  %s1247_s2 = inlined_call_operand.vmem [shape: f32[8,1], index: 2, kind: input, shape index: {}]   ;;  %s1248_s3 = inlined_call_operand.hbm [shape: f32[2,8,256], index: 3, kind: output, shape index: {}]  }
   0x1   :  { %10 = vsyncpa [#allocation4 + $0x1], 0  ;;  %s1071_s12 = smov 0   ;;  %s1073_s13 = smov 0  }
   0x2   :  { %s1075_s14 = smov 0   ;;  %s1077_s15 = smov 0  }
   0x3 LB: > { %s1092_s16 = sadd.s32 4294967295, %s1040_s15   ;;  %s870_s17 = sadd.s32 4294967294, %s1040_s15   ;;  %s1040_s15 = sphi %s1077_s15, %s1254_s15   ;;  %s1036_s14 = sphi %s1075_s14, %s1253_s14   ;;  %s1032_s13 = sphi %s1073_s13, %s1252_s13   ;;  %s1028_s12 = sphi %s1071_s12, %s1251_s12  }
   0x4   : > { %s1096_s18 = sadd.s32 1, %s1040_s15   ;;  %s91_s19 = sadd.s32 1, %s1036_s14 }
   0x5   : > { %s88_s20 = ssub.s32 %s1040_s15, %s1096_s18  ;;  %p101_p0 = scmp.ne.s32.totalorder %s1036_s14, %s1032_s13 }
   0x6   : > { %p89_p1 = scmp.eq.s32.totalorder %s88_s20, 0  ;;  %p102_p2 = scmp.eq.s32.totalorder %s1092_s16, 1 }
   0x7   : > { %p107_p3 = scmp.ne.s32.totalorder %s1032_s13, %s1028_s12  ;;  %p108_p4 = scmp.eq.s32.totalorder %s870_s17, 1 }
   0x8   : > { %s1107_s21 = scalar_select %p89_p1, %s1036_s14, %s91_s19  }
   0x9   : > { %p1109_p5 = por %p102_p2, %p101_p0  ;;  %p1113_p6 = por %p108_p4, %p107_p3 }
   0xa   : > { %p873_p7 = scmp.ge.s32.totalorder %s1040_s15, 1  ;;  %p140_p8 = scmp.lt.s32.totalorder %s1040_s15, 3 }
   0xc   : > { %p141_p9 = pnand %p873_p7, %p140_p8 }
   0xd   : > { %p164_p10 = scmp.lt.s32.totalorder (!%p141_p9), %s1092_s16, 1  ;;  %s1043_s29 = smov (!%p141_p9), 64  }
   0xe   : > { %144 = sbr.rel (%p141_p9) target bundleno = 472 (0x1d8), region = 32  ;;  %s1044_s30 = smov (!%p141_p9), 112  }
   0xf   : > { %s1045_s4 = smov (!%p141_p9), 96   ;;  %s1046_s5 = smov (!%p141_p9), 80  }
  0x10   : > { %s1047_s6 = smov (!%p141_p9), 48   ;;  %s1048_s7 = smov (!%p141_p9), 32  }
  0x11   : > { %s1049_s8 = smov (!%p141_p9), 16   ;;  %s161_s11 = sand.u32 (!%p141_p9), 1, %s1032_s13  }
  0x12   : > { %s874_s17 = sshll.u32 (!%p141_p9), %s161_s11, 4  ;;  %s927_s19 = sshll.u32 (!%p141_p9), %s1092_s16, 4 }
  0x13   : > { %vm169_vm0 = vcmask 519168   ;;  %vm171_vm1 = vcmask 1043968   ;;  %v1042_v0 = vmov 0.0   ;;  %s165_s24 = scalar_select %p164_p10, %s1092_s16, 1  ;;  %vm182_vm2 = vcmask 1047556   ;;  %v187_v37 = vld [vmem:[%s1246_s1] sm:$0xff] }
  0x14   : > { %170 = vst.msk [vmem:[#allocation2] sm:$0xf] %vm169_vm0, %v1042_v0  ;;  %vm178_vm3 = vcmask 523264   ;;  %vm183_vm4 = vmor %vm182_vm2, %vm171_vm1  ;;  %vm213_vm5 = vcmask 1043456   ;;  %vm209_vm6 = vcmask 31744   ;;  %vm206_vm7 = vcmask 916480  }
  0x15   : > { %172 = vst.msk [vmem:[#allocation2 + $0x8] sm:$0xf] %vm171_vm1, %v1042_v0  ;;  %s926_s25 = sshll.u32 %s165_s24, 3  ;;  %vm327_vm8 = vcmask 785408   ;;  %v877_v43 = vld [vmem:[%s1246_s1 + $0x8] sm:$0xff]  ;;  %vm397_vm9 = vcmask 654336  }
  0x16   : > { %s168_s28 = scalar_lea.vmem %s1245_s0, %s926_s25  ;;  %v886_v50 = vld [vmem:[%s1246_s1 + $0x10] sm:$0xff]  ;;  %v891_v52 = vld [vmem:[%s1246_s1 + $0x18] sm:$0xff]  ;;  %v896_v58 = vld [vmem:[%s1246_s1 + $0x20] sm:$0xff]  ;;  %v1050_v62 = vmov 0   ;;  %vm536_vm10 = vcmask 392192   ;;  %vm606_vm11 = vcmask 261120   ;;  %s806_s25 = scalar_lea.hbm %s1248_s3, %s927_s19 }
  0x17   : > { %v173_v1 = vld [vmem:[%s168_s28] sm:$0xff]  ;;  %976 = vset.pattern.permute.xlu1 %v1050_v62  ;;  %977 = vset.pattern.permute.xlu0 %v1050_v62  ;;  %vm676_vm12 = vcmask 130048   ;;  %s163_s26 = scalar_lea.vmem [#allocation3], %s874_s17  ;;  %s810_s28 = sshll.u32 %s806_s25, 4  ;;  %s811_s28 = int_to_ptr.hbm [resolvable:$true] %s810_s28 }
  0x18   : > { %175 = vrot.lane.b32.xlu0 %v173_v1, %s1043_s29  ;;  %v784_v60 = vld [vmem:[%s1247_s2] sm:$0xff]  ;;  %s808_s27 = sshll.u32 %s163_s26, 4  ;;  %s795_s16 = scalar_lea.sflag [#allocation4], %s161_s11  ;;  %s809_s27 = int_to_ptr.vmem [resolvable:$true] %s808_s27 }
  0x8a   : > { %v176_v2 = vpop.permute.xlu0 %175 }
  0x8b   : > { %v177_v3 = vrot.slane %v176_v2, 4 }
  0x8d   : > { %v179_v4 = vsel %vm178_vm3, %v177_v3, %v176_v2  ;;  %185 = vst.msk [vmem:[#allocation2 + $0x8] sm:$0xf] %vm169_vm0, %v177_v3  ;;  %v901_v2 = vld [vmem:[%s1246_s1 + $0x28] sm:$0xff] }
  0x8e   : > { %184 = vst.msk [vmem:[#allocation2] sm:$0xff] %vm183_vm4, %v179_v4 }
  0x94   : > { %v189_v5 = vld [vmem:[#allocation2 + $0x8] sm:$0xf] }
  0x95   : > { %v1128_v6 = vld [vmem:[#allocation2] sm:$0xff]  ;;  %196 = vst [vmem:[#allocation1 + $0x10] ss:$2 sm:$0xff] %v189_v5  ;;  %v310_v10 = vld [vmem:[#allocation2 + $0x8] sm:$0xf] }
  0x96   : > { %194 = vst [vmem:[#allocation1] ss:$2 sm:$0xff] %v1128_v6  ;;  %v380_v11 = vld [vmem:[#allocation2 + $0x8] sm:$0xf] }
  0x97   : > { %v450_v15 = vld [vmem:[#allocation2 + $0x8] sm:$0xf] }
  0x98   : > { %v519_v19 = vld [vmem:[#allocation2 + $0x8] sm:$0xf] }
  0x99   : > { %v589_v23 = vld [vmem:[#allocation2 + $0x8] sm:$0xf] }
  0x9a   : > { %v659_v27 = vld [vmem:[#allocation2 + $0x8] sm:$0xf] }
  0x9b   : > { %v728_v34 = vld [vmem:[#allocation2 + $0x4] sm:$0xff] }
  0x9c   : > { %v199_v7 = vld.sshfl [vmem:[#allocation1 + $0x10] sm:$0xff pattern:$0x75316420] }
  0x9d   : > { %204 = vrot.lane.b32.xlu1 %v199_v7, %s1044_s30  ;;  %v197_v8 = vld.sshfl [vmem:[#allocation1] sm:$0xff pattern:$0x75316420]  ;;  %v198_v9 = vld.sshfl [vmem:[#allocation1 + $0x8] sm:$0xff pattern:$0x75316420] }
  0x9e   : > { %200 = vrot.lane.b32.xlu0 %v197_v8, %s1044_s30  ;;  %259 = vst [vmem:[#allocation1] ss:$2 sm:$0xff] %v1128_v6 }
  0x9f   : > { %317 = vst [vmem:[#allocation1 + $0x10] ss:$2 sm:$0xff] %v310_v10 }
  0xa5   : > { %202 = vrot.lane.b32.xlu1 %v198_v9, %s1044_s30  ;;  %v260_v12 = vld.sshfl [vmem:[#allocation1] sm:$0xff pattern:$0x75316420]  ;;  %v261_v13 = vld.sshfl [vmem:[#allocation1 + $0x8] sm:$0xff pattern:$0x75316420] }
  0xa6   : > { %v320_v14 = vld.sshfl [vmem:[#allocation1 + $0x10] sm:$0xff pattern:$0x75316420]  ;;  %882 = vmatpush.msk.msra.mxu2 %vm213_vm5, %v260_v12  ;;  %884 = vmatpush.msk.msra.mxu3 %vm213_vm5, %v261_v13  ;;  %315 = vst [vmem:[#allocation1] ss:$2 sm:$0xff] %v1128_v6 }
  0xa7   : > { %387 = vst [vmem:[#allocation1 + $0x10] ss:$2 sm:$0xff] %v380_v11  ;;  %325 = vrot.lane.b32.xlu0 %v320_v14, %s1045_s4  ;;  %885 = vmatmul.msk.f32.vlgmr.msra.gmra.mxu3 %vm209_vm6, %v187_v37  ;;  %v906_v9 = vld [vmem:[%s1246_s1 + $0x30] sm:$0xff] }
  0xa8   : > { %883 = vmatmul.msk.f32.vlgmr.msra.gmra.mxu2 %vm209_vm6, %v187_v37 }
  0xad   : > { %v318_v16 = vld.sshfl [vmem:[#allocation1] sm:$0xff pattern:$0x75316420]  ;;  %v319_v17 = vld.sshfl [vmem:[#allocation1 + $0x8] sm:$0xff pattern:$0x75316420] }
  0xae   : > { %v390_v18 = vld.sshfl [vmem:[#allocation1 + $0x10] sm:$0xff pattern:$0x75316420]  ;;  %321 = vrot.lane.b32.xlu2 %v318_v16, %s1045_s4  ;;  %385 = vst [vmem:[#allocation1] ss:$2 sm:$0xff] %v1128_v6 }
  0xaf   : > { %457 = vst [vmem:[#allocation1 + $0x10] ss:$2 sm:$0xff] %v450_v15  ;;  %395 = vrot.lane.b32.xlu0 %v390_v18, %s1046_s5  ;;  %v911_v15 = vld [vmem:[%s1246_s1 + $0x38] sm:$0xff]  ;;  %v916_v18 = vld [vmem:[%s1246_s1 + $0x40] sm:$0xff] }
  0xb5   : > { %v388_v20 = vld.sshfl [vmem:[#allocation1] sm:$0xff pattern:$0x75316420]  ;;  %v389_v21 = vld.sshfl [vmem:[#allocation1 + $0x8] sm:$0xff pattern:$0x75316420] }
  0xb6   : > { %v460_v22 = vld.sshfl [vmem:[#allocation1 + $0x10] sm:$0xff pattern:$0x75316420]  ;;  %323 = vrot.lane.b32.xlu2 %v319_v17, %s1045_s4  ;;  %391 = vrot.lane.b32.xlu1 %v388_v20, %s1046_s5  ;;  %455 = vst [vmem:[#allocation1] ss:$2 sm:$0xff] %v1128_v6 }
  0xb7   : > { %526 = vst [vmem:[#allocation1 + $0x10] ss:$2 sm:$0xff] %v519_v19  ;;  %465 = vrot.lane.b32.xlu0 %v460_v22, %s1043_s29 }
  0xbd   : > { %v458_v24 = vld.sshfl [vmem:[#allocation1] sm:$0xff pattern:$0x75316420]  ;;  %v459_v25 = vld.sshfl [vmem:[#allocation1 + $0x8] sm:$0xff pattern:$0x75316420] }
  0xbe   : > { %v529_v26 = vld.sshfl [vmem:[#allocation1 + $0x10] sm:$0xff pattern:$0x75316420]  ;;  %393 = vrot.lane.b32.xlu2 %v389_v21, %s1046_s5  ;;  %461 = vrot.lane.b32.xlu1 %v458_v24, %s1043_s29  ;;  %524 = vst [vmem:[#allocation1] ss:$2 sm:$0xff] %v1128_v6 }
  0xbf   : > { %596 = vst [vmem:[#allocation1 + $0x10] ss:$2 sm:$0xff] %v589_v23  ;;  %534 = vrot.lane.b32.xlu0 %v529_v26, %s1047_s6 }
  0xc5   : > { %v527_v28 = vld.sshfl [vmem:[#allocation1] sm:$0xff pattern:$0x75316420]  ;;  %v528_v29 = vld.sshfl [vmem:[#allocation1 + $0x8] sm:$0xff pattern:$0x75316420] }
  0xc6   : > { %v599_v30 = vld.sshfl [vmem:[#allocation1 + $0x10] sm:$0xff pattern:$0x75316420]  ;;  %463 = vrot.lane.b32.xlu2 %v459_v25, %s1043_s29  ;;  %530 = vrot.lane.b32.xlu1 %v527_v28, %s1047_s6  ;;  %594 = vst [vmem:[#allocation1] ss:$2 sm:$0xff] %v1128_v6  ;;  %s992_s29 = sshra.s32 %s811_s28, 4  ;;  %s993_s29 = int_to_ptr.hbm [resolvable:$true] %s992_s29 }
  0xc7   : > { %666 = vst [vmem:[#allocation1 + $0x10] ss:$2 sm:$0xff] %v659_v27  ;;  %604 = vrot.lane.b32.xlu0 %v599_v30, %s1048_s7  ;;  %s994_s30 = scalar_lea.hbm %s993_s29, 16  ;;  %p999_p0 = scmp.lt.s32.totalorder %s993_s29, %s1248_s3 }
  0xc8   : > { %p995_p11 = scmp.ne.s32.totalorder %s993_s29, %s994_s30 }
  0xca   : > { %p996_p12 = pnand %p995_p11, %p1109_p5 }
  0xcc   : > { %p997_p13 = pneg %p996_p12 }
  0xcd   : > { %v597_v31 = vld.sshfl [vmem:[#allocation1] sm:$0xff pattern:$0x75316420]  ;;  %v598_v32 = vld.sshfl [vmem:[#allocation1 + $0x8] sm:$0xff pattern:$0x75316420] }
  0xce   : > { %v669_v33 = vld.sshfl [vmem:[#allocation1 + $0x10] sm:$0xff pattern:$0x75316420]  ;;  %532 = vrot.lane.b32.xlu2 %v528_v29, %s1047_s6  ;;  %600 = vrot.lane.b32.xlu1 %v597_v31, %s1048_s7  ;;  %664 = vst [vmem:[#allocation1] ss:$2 sm:$0xff] %v1128_v6  ;;  %s998_s6 = scalar_lea.hbm %s1248_s3, 32 }
  0xcf   : > { %674 = vrot.lane.b32.xlu0 %v669_v33, %s1049_s8  ;;  %p1000_p1 = scmp.lt.s32.totalorder %s998_s6, %s994_s30 }
  0xd1   : > { %p1001_p2 = por %p1000_p1, %p999_p0 }
  0xd3   : > { %p1002_p3 = pnand %p1001_p2, %p997_p13 }
  0xd5   : > { %v667_v35 = vld.sshfl [vmem:[#allocation1] sm:$0xff pattern:$0x75316420]  ;;  %v668_v36 = vld.sshfl [vmem:[#allocation1 + $0x8] sm:$0xff pattern:$0x75316420] }
  0xd6   : > { %602 = vrot.lane.b32.xlu2 %v598_v32, %s1048_s7  ;;  %670 = vrot.lane.b32.xlu1 %v667_v35, %s1049_s8  ;;  %732 = vst [vmem:[#allocation1] ss:$2 sm:$0xff] %v728_v34 }
  0xdd   : > { %v734_v10 = vld.sshfl [vmem:[#allocation1 + $0x8] sm:$0xff pattern:$0x75316420]  ;;  %v733_v17 = vld.sshfl [vmem:[#allocation1] sm:$0xff pattern:$0x75316420] }
  0xde   : > { %672 = vrot.lane.b32.xlu2 %v668_v36, %s1049_s8  ;;  %787 = vperm.xlu1 %976, %v784_v60  }
 0x108   : > { %v322_v38 = vpop.permute.xlu2 %321 }
 0x10f   : > { %v205_v39 = vpop.permute.xlu1 %204 }
 0x110   : > { %v201_v40 = vpop.permute.xlu0 %200  ;;  %v324_v41 = vpop.permute.xlu2 %323 }
 0x111   : > { %v328_v48 = vsel %vm327_vm8, %v322_v38, %v324_v41 }
 0x117   : > { %v203_v42 = vpop.permute.xlu1 %202 }
 0x118   : > { %v207_v44 = vsel %vm206_vm7, %v201_v40, %v203_v42  ;;  %v208_v45 = vsel %vm206_vm7, %v203_v42, %v205_v39  ;;  %v394_v47 = vpop.permute.xlu2 %393 }
 0x119   : > { %v326_v46 = vpop.permute.xlu0 %325  ;;  %878 = vmatpush.msk.msra.mxu0 %vm213_vm5, %v207_v44  ;;  %880 = vmatpush.msk.msra.mxu1 %vm213_vm5, %v208_v45 }
 0x11a   : > { %v329_v49 = vsel %vm327_vm8, %v324_v41, %v326_v46  ;;  %881 = vmatmul.msk.f32.vlgmr.msra.gmra.mxu1 %vm209_vm6, %v877_v43  ;;  %879 = vmatmul.msk.f32.vlgmr.msra.gmra.mxu0 %vm209_vm6, %v877_v43 }
 0x11b   : > { %887 = vmatpush.msk.msrb.mxu0 %vm213_vm5, %v328_v48  ;;  %889 = vmatpush.msk.msrb.mxu1 %vm213_vm5, %v329_v49 }
 0x120   : > { %v464_v54 = vpop.permute.xlu2 %463 }
 0x121   : > { %v396_v51 = vpop.permute.xlu0 %395 }
 0x122   : > { %v399_v53 = vsel %vm397_vm9, %v394_v47, %v396_v51  ;;  %890 = vmatmul.msk.f32.vlgmr.msrb.gmra.mxu1 %vm209_vm6, %v886_v50  ;;  %888 = vmatmul.msk.f32.vlgmr.msrb.gmra.mxu0 %vm209_vm6, %v886_v50 }
 0x123   : > { %894 = vmatpush.msk.msrb.mxu3 %vm213_vm5, %v399_v53 }
 0x124   : > { %895 = vmatmul.msk.f32.vlgmr.msrb.gmra.mxu3 %vm209_vm6, %v891_v52 }
 0x128   : > { %v392_v55 = vpop.permute.xlu1 %391  ;;  %v533_v61 = vpop.permute.xlu2 %532 }
 0x129   : > { %v466_v56 = vpop.permute.xlu0 %465  ;;  %v398_v57 = vsel %vm397_vm9, %v392_v55, %v394_v47 }
 0x12a   : > { %v468_v59 = vsel %vm178_vm3, %v464_v54, %v466_v56  ;;  %892 = vmatpush.msk.msrb.mxu2 %vm213_vm5, %v398_v57  ;;  %v306_v23 = vpop.f32.mrf.mxu3 }
 0x12b   : > { %899 = vmatpush.msk.msra.mxu1 %vm213_vm5, %v468_v59  ;;  %893 = vmatmul.msk.f32.vlgmr.msrb.gmra.mxu2 %vm209_vm6, %v891_v52  ;;  %v286_v26 = vpop.f32.mrf.mxu2 }
 0x12c   : > { %900 = vmatmul.msk.f32.vlgmr.msra.gmra.mxu1 %vm209_vm6, %v896_v58 }
 0x130   : > { %v462_v63 = vpop.permute.xlu1 %461  ;;  %v603_v4 = vpop.permute.xlu2 %602 }
 0x131   : > { %v535_v0 = vpop.permute.xlu0 %534  ;;  %v467_v1 = vsel %vm178_vm3, %v462_v63, %v464_v54 }
 0x132   : > { %v538_v3 = vsel %vm536_vm10, %v533_v61, %v535_v0  ;;  %897 = vmatpush.msk.msra.mxu0 %vm213_vm5, %v467_v1 }
 0x133   : > { %904 = vmatpush.msk.msra.mxu3 %vm213_vm5, %v538_v3  ;;  %898 = vmatmul.msk.f32.vlgmr.msra.gmra.mxu0 %vm209_vm6, %v896_v58 }
 0x134   : > { %905 = vmatmul.msk.f32.vlgmr.msra.gmra.mxu3 %vm209_vm6, %v901_v2 }
 0x138   : > { %v531_v5 = vpop.permute.xlu1 %530  ;;  %v673_v12 = vpop.permute.xlu2 %672 }
 0x139   : > { %v605_v6 = vpop.permute.xlu0 %604  ;;  %v537_v7 = vsel %vm536_vm10, %v531_v5, %v533_v61 }
 0x13a   : > { %v608_v8 = vsel %vm606_vm11, %v603_v4, %v605_v6  ;;  %902 = vmatpush.msk.msra.mxu2 %vm213_vm5, %v537_v7 }
 0x13b   : > { %909 = vmatpush.msk.msrb.mxu1 %vm213_vm5, %v608_v8  ;;  %903 = vmatmul.msk.f32.vlgmr.msra.gmra.mxu2 %vm209_vm6, %v901_v2 }
 0x13c   : > { %910 = vmatmul.msk.f32.vlgmr.msrb.gmra.mxu1 %vm209_vm6, %v906_v9 }
 0x13d   : > { %919 = vmatpush.msk.msra.mxu1 %vm213_vm5, %v734_v10 }
 0x140   : > { %v601_v11 = vpop.permute.xlu1 %600 }
 0x141   : > { %v675_v13 = vpop.permute.xlu0 %674  ;;  %v607_v14 = vsel %vm606_vm11, %v601_v11, %v603_v4 }
 0x142   : > { %v678_v16 = vsel %vm676_vm12, %v673_v12, %v675_v13  ;;  %907 = vmatpush.msk.msrb.mxu0 %vm213_vm5, %v607_v14 }
 0x143   : > { %914 = vmatpush.msk.msrb.mxu3 %vm213_vm5, %v678_v16  ;;  %908 = vmatmul.msk.f32.vlgmr.msrb.gmra.mxu0 %vm209_vm6, %v906_v9 }
 0x144   : > { %917 = vmatpush.msk.msra.mxu0 %vm213_vm5, %v733_v17  ;;  %915 = vmatmul.msk.f32.vlgmr.msrb.gmra.mxu3 %vm209_vm6, %v911_v15 }
 0x145   : > { %920 = vmatmul.msk.f32.vlgmr.msra.gmra.mxu1 %vm209_vm6, %v916_v18 }
 0x148   : > { %v671_v19 = vpop.permute.xlu1 %670 }
 0x149   : > { %v677_v20 = vsel %vm676_vm12, %v671_v19, %v673_v12 }
 0x14a   : > { %912 = vmatpush.msk.msrb.mxu2 %vm213_vm5, %v677_v20 }
 0x14b   : > { %913 = vmatmul.msk.f32.vlgmr.msrb.gmra.mxu2 %vm209_vm6, %v911_v15  ;;  %918 = vmatmul.msk.f32.vlgmr.msra.gmra.mxu0 %vm209_vm6, %v916_v18 }
 0x150   : > { %v788_v49 = vpop.permute.xlu1 %787 }
 0x197   : > { %v255_v21 = vpop.f32.mrf.mxu1  ;;  %v235_v22 = vpop.f32.mrf.mxu0 }
 0x198   : > { %v307_v25 = vadd.f32 %v306_v23, %v255_v21  ;;  %v287_v32 = vadd.f32 %v286_v26, %v235_v22 }
 0x19f   : > { %v374_v24 = vpop.f32.mrf.mxu1  ;;  %v354_v27 = vpop.f32.mrf.mxu0 }
 0x1a0   : > { %v378_v30 = vadd.f32 %v374_v24, %v307_v25  ;;  %v377_v36 = vadd.f32 %v354_v27, %v287_v32 }
 0x1a7   : > { %v444_v28 = vpop.f32.mrf.mxu3 }
 0x1a8   : > { %v448_v31 = vadd.f32 %v444_v28, %v378_v30 }
 0x1a9   : > { %v513_v29 = vpop.f32.mrf.mxu1 }
 0x1aa   : > { %v517_v34 = vadd.f32 %v513_v29, %v448_v31 }
 0x1ae   : > { %v424_v33 = vpop.f32.mrf.mxu2 }
 0x1af   : > { %v447_v40 = vadd.f32 %v424_v33, %v377_v36 }
 0x1b0   : > { %v493_v35 = vpop.f32.mrf.mxu0 }
 0x1b1   : > { %v516_v44 = vadd.f32 %v493_v35, %v447_v40 }
 0x1b7   : > { %v583_v37 = vpop.f32.mrf.mxu3 }
 0x1b8   : > { %v587_v39 = vadd.f32 %v583_v37, %v517_v34 }
 0x1b9   : > { %v653_v38 = vpop.f32.mrf.mxu1 }
 0x1ba   : > { %v657_v42 = vadd.f32 %v653_v38, %v587_v39 }
 0x1be   : > { %v563_v41 = vpop.f32.mrf.mxu2 }
 0x1bf   : > { %v586_v48 = vadd.f32 %v563_v41, %v516_v44 }
 0x1c0   : > { %v633_v43 = vpop.f32.mrf.mxu0 }
 0x1c1   : > { %v656_v52 = vadd.f32 %v633_v43, %v586_v48 }
 0x1c2   : > { %v779_v46 = vpop.f32.mrf.mxu1 }
 0x1c7   : > { %v723_v45 = vpop.f32.mrf.mxu3 }
 0x1c8   : > { %v727_v47 = vadd.f32 %v723_v45, %v657_v42  ;;  %v759_v54 = vpop.f32.mrf.mxu0 }
 0x1ca   : > { %v783_v50 = vadd.f32 %v779_v46, %v727_v47 }
 0x1cc   : > { %v791_v51 = vadd.f32 %v788_v49, %v783_v50 }
 0x1ce   : > { %793 = vst [vmem:[%s163_s26 + $0x8] sm:$0xff] %v791_v51  ;;  %v703_v53 = vpop.f32.mrf.mxu2 }
 0x1cf   : > { %v726_v55 = vadd.f32 %v703_v53, %v656_v52 }
 0x1d1   : > { %v782_v56 = vadd.f32 %v759_v54, %v726_v55 }
 0x1d3   : > { %v790_v57 = vadd.f32 %v788_v49, %v782_v56 }
 0x1d5   : > { %792 = vst [vmem:[%s163_s26] sm:$0xff] %v790_v57 }
 0x1d6   : > { %1005 = shalt.err (!%p1002_p3)
}
 0x1d7   : > { %928 = dma.vmem_to_hbm [thread:$0]  (%p1109_p5), %s809_s27, 256, %s811_s28, %s795_s16  }
 0x1d8 PF: > { %p934_p4 = scmp.ge.s32.totalorder %s1040_s15, 2  ;;  %s822_s9 = sand.u32 1, %s1028_s12  }
 0x1d9   : > { %s823_s10 = scalar_lea.sflag [#allocation4], %s822_s9 }
 0x1da   : > { %p931_p7 = pnand %p934_p4, %p1113_p6 }
 0x1dc   : > { %p932_p8 = pneg %p931_p7 }
 0x1de   : > { %1023 = dma.done.wait (%p932_p8), %s823_s10, 256  }
 0x1df   : > { %1025 = vsyncadd (%p932_p8), %s823_s10, 4294967040  ;;  %p13_p9 = scmp.ge.s32.totalorder %s1096_s18, 4   ;;  %s1251_s12 = smov %s1032_s13 }
 0x1e0   : > { %s1252_s13 = smov %s1036_s14  ;;  %s1253_s14 = smov %s1107_s21 }
 0x1e1   : > { %s1254_s15 = smov %s1096_s18  ;;  %15 = sbr.rel (!%p13_p9) target bundleno = 3 (0x3), region = 82 }
 0x1e6   :  { %829 = vsyncpa [#allocation4], 1 }
 0x1e7   :  { %831 = vsyncpa [#allocation4 + $0x1], 1 }

</bundles_post_ra>
